<compile_context>
chip_gen: v6e
topology: v6e:2x2x1
jax: 0.10.0
libtpu: 0.0.40
codegen_flags: <defaults>
</compile_context>

<pallas_src>
import math
import functools

import jax
import jax.numpy as jnp
from jax.experimental import pallas as pl
from jax.experimental.pallas import tpu as pltpu


_LANE = 128
_TB_MAX = 256      # batch tile
_TN_MAX = 512      # output-feature tile (multiple of 256: lane-dense stores on v5e)
_TK_MAX = 1024     # reduction tile


# ----------------------------- helpers -------------------------------------

def _round_up(x: int, m: int) -> int:
    return ((x + m - 1) // m) * m


@functools.lru_cache(maxsize=None)
def _vmem_capacity_bytes() -> int:
    try:
        return int(pltpu.get_tpu_info().vmem_capacity_bytes)
    except Exception:
        return 64 * 1024 * 1024   # conservative (v7x per-TC VMEM)


def _split_dim(size: int, max_tile: int, align: int):
    """Pick (tile, padded) with tile % align == 0 (or tile == padded dim)."""
    padded = _round_up(size, align)
    if padded <= max_tile:
        return padded, padded
    n = -(-padded // max_tile)
    tile = _round_up(-(-padded // n), align)
    return tile, n * tile


def _plan(B: int, K: int, N: int, itemsize: int, n_weight_streams: int):
    """Tile sizes + padded dims.  Weight dims (Kp, Np) do not depend on B."""
    sub = max(8, 32 // max(1, itemsize))          # dtype-aware sublane multiple
    tb, Bp = _split_dim(B, _TB_MAX, sub)

    # Residency test (conservative: double-buffered weight streams, worst-case
    # f32 eps/w temporaries, double-buffered x / out tiles, accumulators).
    Kp_res = _round_up(K, sub)                    # full-extent K block: no 128 pad
    Np_res = _round_up(N, _LANE)                  # keep lane-dense output stores
    resident_cost = (2 * n_weight_streams * Kp_res * Np_res * itemsize
                     + 2 * Kp_res * Np_res * 4
                     + 2 * _TB_MAX * Kp_res * itemsize
                     + 4 * _TB_MAX * Np_res * 4)
    if resident_cost <= int(0.55 * _vmem_capacity_bytes()):
        # Weights stay VMEM-resident: single full-extent (K, N) block with a
        # constant block index -> Pallas DMAs them once, never re-streams them
        # per batch tile.
        tk, Kp = Kp_res, Kp_res
        tn, Np = Np_res, Np_res
    else:
        tk, Kp = _split_dim(K, _TK_MAX, _LANE)
        tn, Np = _split_dim(N, _TN_MAX, _LANE)

    # v7x has 2 TensorCores: expose >=2 parallel (i, j) blocks when the grid
    # would otherwise collapse to a single one.
    nb, nn = Bp // tb, Np // tn
    if nb * nn == 1 and Np >= 2 * _LANE and (Np // _LANE) % 2 == 0:
        tn = Np // 2

    return tb, tn, tk, Bp, Kp, Np


def _weight_pad_dims(K: int, N: int, itemsize: int, n_weight_streams: int):
    _, _, _, _, Kp, Np = _plan(1, K, N, itemsize, n_weight_streams)
    return Kp, Np


def _vmem_limit_bytes(tb, tk, tn, n_w, itemsize):
    """Scoped-VMEM request derived from the tile plan, generation-aware cap."""
    cap = max(16 << 20, int(0.75 * _vmem_capacity_bytes()))   # ~96 MiB v5e/v6e, ~48 MiB v7x
    dbuf = 2
    est = (dbuf * (tb * tk + n_w * tk * tn + 2 * tn) * itemsize   # inputs
           + dbuf * tb * tn * itemsize                            # output
           + 2 * tb * tn * 4                                      # f32 accumulators
           + 2 * tk * tn * 4)                                     # eps / fused-w temps
    return int(min(cap, max(16 << 20, 2 * est)))


# ----------------------------- Pallas kernels ------------------------------

def _mu_kernel(x_ref, w_ref, b_ref, o_ref, acc_ref):
    # x: (tb, tk), w: (tk, tn) [pre-transposed], b: (1, tn), o: (tb, tn)
    @pl.when(pl.program_id(2) == 0)
    def _():
        acc_ref[...] = jnp.zeros_like(acc_ref)

    acc_ref[...] += jnp.dot(x_ref[...], w_ref[...],
                            preferred_element_type=jnp.float32)

    @pl.when(pl.program_id(2) == pl.num_programs(2) - 1)
    def _():
        o_ref[...] = (acc_ref[...] + b_ref[...]).astype(o_ref.dtype)


def _sample_two_dot_kernel(x_ref, mu_ref, eps_ref, sigma_ref, b_ref, o_ref,
                           acc_mu_ref, acc_eps_ref):
    # Memory-bound (small B) form: never build W.
    #   y = x@mu_t + sigma_row * (x@eps_t) + b
    @pl.when(pl.program_id(2) == 0)
    def _():
        acc_mu_ref[...] = jnp.zeros_like(acc_mu_ref)
        acc_eps_ref[...] = jnp.zeros_like(acc_eps_ref)

    x = x_ref[...]
    acc_mu_ref[...] += jnp.dot(x, mu_ref[...],
                               preferred_element_type=jnp.float32)
    acc_eps_ref[...] += jnp.dot(x, eps_ref[...],
                                preferred_element_type=jnp.float32)

    @pl.when(pl.program_id(2) == pl.num_programs(2) - 1)
    def _():
        o_ref[...] = (acc_mu_ref[...]
                      + sigma_ref[...] * acc_eps_ref[...]
                      + b_ref[...]).astype(o_ref.dtype)


def _sample_fused_kernel(x_ref, mu_ref, eps_ref, sigma_ref, b_ref, o_ref,
                         acc_ref):
    # Compute-bound (large B) form: build W on the VPU (rides idle VALU slots),
    # single matmul, single accumulator.
    @pl.when(pl.program_id(2) == 0)
    def _():
        acc_ref[...] = jnp.zeros_like(acc_ref)

    w = mu_ref[...] + sigma_ref[...] * eps_ref[...]
    acc_ref[...] += jnp.dot(x_ref[...], w, preferred_element_type=jnp.float32)

    @pl.when(pl.program_id(2) == pl.num_programs(2) - 1)
    def _():
        o_ref[...] = (acc_ref[...] + b_ref[...]).astype(o_ref.dtype)


def _sample_prng_kernel(seed_ref, x_ref, mu_ref, sigma_ref, b_ref, o_ref,
                        acc_ref, *, tile_k, tile_n):
    # eps generated on-chip; no eps HBM array at all.
    @pl.when(pl.program_id(2) == 0)
    def _():
        acc_ref[...] = jnp.zeros_like(acc_ref)

    # Seed depends on the (j, k) weight-tile index only -> every batch tile i
    # sees the SAME sampled W (required for correct layer semantics).
    j = pl.program_id(1)
    k = pl.program_id(2)
    pltpu.prng_seed(seed_ref[0] + j * pl.num_programs(2) + k)
    eps = pltpu.stateful_normal((tile_k, tile_n), jnp.float32)

    w = (mu_ref[...].astype(jnp.float32)
         + sigma_ref[...].astype(jnp.float32) * eps).astype(x_ref.dtype)
    acc_ref[...] += jnp.dot(x_ref[...], w, preferred_element_type=jnp.float32)

    @pl.when(pl.program_id(2) == pl.num_programs(2) - 1)
    def _():
        o_ref[...] = (acc_ref[...] + b_ref[...]).astype(o_ref.dtype)


# ------------------------ cached pallas_call builders -----------------------

@functools.lru_cache(maxsize=None)
def _build_mu_forward(B, K, N, dtype_name):
    dtype = jnp.dtype(dtype_name)
    tb, tn, tk, Bp, Kp, Np = _plan(B, K, N, dtype.itemsize, 1)
    grid = (Bp // tb, Np // tn, Kp // tk)

    call = pl.pallas_call(
        _mu_kernel,
        out_shape=jax.ShapeDtypeStruct((Bp, Np), dtype),
        grid_spec=pltpu.PrefetchScalarGridSpec(
            num_scalar_prefetch=0,
            grid=grid,
            in_specs=[
                pl.BlockSpec((tb, tk), lambda i, j, k: (i, k)),   # x
                pl.BlockSpec((tk, tn), lambda i, j, k: (k, j)),   # mu^T
                pl.BlockSpec((1, tn), lambda i, j, k: (0, j)),    # bias row
            ],
            out_specs=pl.BlockSpec((tb, tn), lambda i, j, k: (i, j)),
            scratch_shapes=[pltpu.VMEM((tb, tn), jnp.float32)],
        ),
        compiler_params=pltpu.CompilerParams(
            dimension_semantics=("parallel", "parallel", "arbitrary"),
            vmem_limit_bytes=_vmem_limit_bytes(tb, tk, tn, 1, dtype.itemsize)),
    )

    def fwd(x, mu_t_p, bias_row_p):
        if (Bp, Kp) != (B, K):
            x = jnp.pad(x, ((0, Bp - B), (0, Kp - K)))
        out = call(x, mu_t_p, bias_row_p)
        return out[:B, :N] if (Bp, Np) != (B, N) else out

    return jax.jit(fwd), (Kp, Np)


@functools.lru_cache(maxsize=None)
def _build_sample_forward(B, K, N, dtype_name):
    dtype = jnp.dtype(dtype_name)
    tb, tn, tk, Bp, Kp, Np = _plan(B, K, N, dtype.itemsize, 2)
    grid = (Bp // tb, Np // tn, Kp // tk)

    fuse = B >= 256   # compute-bound => one matmul; memory-bound => two matmuls
    if fuse:
        kernel = _sample_fused_kernel
        scratch = [pltpu.VMEM((tb, tn), jnp.float32)]
    else:
        kernel = _sample_two_dot_kernel
        scratch = [pltpu.VMEM((tb, tn), jnp.float32),
                   pltpu.VMEM((tb, tn), jnp.float32)]

    call = pl.pallas_call(
        kernel,
        out_shape=jax.ShapeDtypeStruct((Bp, Np), dtype),
        grid_spec=pltpu.PrefetchScalarGridSpec(
            num_scalar_prefetch=0,
            grid=grid,
            in_specs=[
                pl.BlockSpec((tb, tk), lambda i, j, k: (i, k)),   # x
                pl.BlockSpec((tk, tn), lambda i, j, k: (k, j)),   # mu^T
                pl.BlockSpec((tk, tn), lambda i, j, k: (k, j)),   # eps^T
                pl.BlockSpec((1, tn), lambda i, j, k: (0, j)),    # sigma row
                pl.BlockSpec((1, tn), lambda i, j, k: (0, j)),    # bias row
            ],
            out_specs=pl.BlockSpec((tb, tn), lambda i, j, k: (i, j)),
            scratch_shapes=scratch,
        ),
        compiler_params=pltpu.CompilerParams(
            dimension_semantics=("parallel", "parallel", "arbitrary"),
            vmem_limit_bytes=_vmem_limit_bytes(tb, tk, tn, 2, dtype.itemsize)),
    )

    def fwd(x, mu_t_p, eps_t_p, sigma_row_p, bias_row_p):
        if (Bp, Kp) != (B, K):
            x = jnp.pad(x, ((0, Bp - B), (0, Kp - K)))
        out = call(x, mu_t_p, eps_t_p, sigma_row_p, bias_row_p)
        return out[:B, :N] if (Bp, Np) != (B, N) else out

    return jax.jit(fwd), (Kp, Np)


@functools.lru_cache(maxsize=None)
def _build_sample_prng_forward(B, K, N, dtype_name):
    dtype = jnp.dtype(dtype_name)
    # Plan as if there were 2 weight streams: leaves room for the on-chip eps/w
    # temporaries, and shares (Kp, Np) with the explicit-eps path.
    tb, tn, tk, Bp, Kp, Np = _plan(B, K, N, dtype.itemsize, 2)
    grid = (Bp // tb, Np // tn, Kp // tk)

    kernel = functools.partial(_sample_prng_kernel, tile_k=tk, tile_n=tn)

    call = pl.pallas_call(
        kernel,
        out_shape=jax.ShapeDtypeStruct((Bp, Np), dtype),
        grid_spec=pltpu.PrefetchScalarGridSpec(
            num_scalar_prefetch=1,   # int32 seed -> SMEM
            grid=grid,
            in_specs=[
                pl.BlockSpec((tb, tk), lambda i, j, k, seed: (i, k)),   # x
                pl.BlockSpec((tk, tn), lambda i, j, k, seed: (k, j)),   # mu^T
                pl.BlockSpec((1, tn), lambda i, j, k, seed: (0, j)),    # sigma row
                pl.BlockSpec((1, tn), lambda i, j, k, seed: (0, j)),    # bias row
            ],
            out_specs=pl.BlockSpec((tb, tn), lambda i, j, k, seed: (i, j)),
            scratch_shapes=[pltpu.VMEM((tb, tn), jnp.float32)],
        ),
        compiler_params=pltpu.CompilerParams(
            dimension_semantics=("parallel", "parallel", "arbitrary"),
            vmem_limit_bytes=_vmem_limit_bytes(tb, tk, tn, 1, dtype.itemsize)),
    )

    def fwd(seed, x, mu_t_p, sigma_row_p, bias_row_p):
        if (Bp, Kp) != (B, K):
            x = jnp.pad(x, ((0, Bp - B), (0, Kp - K)))
        out = call(seed, x, mu_t_p, sigma_row_p, bias_row_p)
        return out[:B, :N] if (Bp, Np) != (B, N) else out

    return jax.jit(fwd), (Kp, Np)


# ------------------------------ JAX wrapper ---------------------------------

class BayesianLinearPallas:
    """Pallas implementation of the BayesianLinear forward pass."""

    def __init__(self, in_features: int, out_features: int, ratio: float = 0.5,
                 key=None, dtype=jnp.float32):
        self.in_features = in_features
        self.out_features = out_features
        self.dtype = jnp.dtype(dtype)

        if key is None:
            key = jax.random.PRNGKey(0)

        # --- deterministic init mirroring the PyTorch __init__ ---
        fan_in = in_features
        total_var = 2.0 / fan_in
        noise_var = total_var * ratio
        mu_var = total_var - noise_var
        noise_std = math.sqrt(noise_var)
        mu_std = math.sqrt(mu_var)
        bound = math.sqrt(3.0) * mu_std
        rho_init = math.log(math.exp(noise_std) - 1.0)

        self.weight_mu = jax.random.uniform(
            key, (out_features, in_features), dtype=self.dtype,
            minval=-bound, maxval=bound)
        self.weight_rho = jnp.full((out_features, 1), rho_init, dtype=self.dtype)
        self.bias = jnp.zeros((out_features,), dtype=self.dtype)

        # Pre-transposed / pre-reduced, lane-dense parameter views (one-time).
        self._weight_mu_t = jnp.asarray(self.weight_mu.T)                      # (K, N)
        self._sigma_row = jax.nn.softplus(
            self.weight_rho.astype(jnp.float32)).astype(self.dtype).reshape(1, -1)
        self._bias_row = self.bias.reshape(1, -1)

        # Pre-padded parameter cache keyed by (Kp, Np) — weight-side padding is
        # hoisted out of the per-call path entirely.
        self._padded = {}
        for n_streams in (1, 2):
            Kp, Np = _weight_pad_dims(in_features, out_features,
                                      self.dtype.itemsize, n_streams)
            self._padded_params(Kp, Np)

        # TODO(synk): optional bf16 weight/eps storage path (halves weight HBM
        # bytes, native bf16 MXU on v6e/v7x); gated on an accuracy flag.

    # ------------------------------------------------------------------
    def _padded_params(self, Kp, Np):
        key = (Kp, Np)
        if key not in self._padded:
            K, N = self.in_features, self.out_features
            mu_p = jnp.pad(self._weight_mu_t, ((0, Kp - K), (0, Np - N)))
            sig_p = jnp.pad(self._sigma_row, ((0, 0), (0, Np - N)))
            b_p = jnp.pad(self._bias_row, ((0, 0), (0, Np - N)))
            self._padded[key] = (mu_p, sig_p, b_p)
        return self._padded[key]

    # ------------------------------------------------------------------
    def __call__(self, x, sample: bool = False, eps=None, key=None, seed=None):
        """Forward pass.  x: (B, in_features) -> (B, out_features)."""
        B, K = x.shape
        N = self.out_features
        assert K == self.in_features
        x = jnp.asarray(x, dtype=self.dtype)
        dtype_name = self.dtype.name

        if not sample:
            fwd, (Kp, Np) = _build_mu_forward(B, K, N, dtype_name)
            mu_p, _, b_p = self._padded_params(Kp, Np)
            return fwd(x, mu_p, b_p)

        if eps is not None:
            # Caller-provided epsilon in the torch weight layout (N, K).
            eps = jnp.asarray(eps, dtype=self.dtype)
            fwd, (Kp, Np) = _build_sample_forward(B, K, N, dtype_name)
            mu_p, sig_p, b_p = self._padded_params(Kp, Np)
            eps_t = eps.T
            if (Kp, Np) != (K, N):
                eps_t = jnp.pad(eps_t, ((0, Kp - K), (0, Np - N)))
            return fwd(x, mu_p, eps_t, sig_p, b_p)

        # Default sample path: eps drawn on-chip with the TPU PRNG.
        if seed is None:
            if key is None:
                key = jax.random.PRNGKey(1)
            seed = int(jax.random.randint(key, (), 0, 2 ** 31 - 1))
        try:
            fwd, (Kp, Np) = _build_sample_prng_forward(B, K, N, dtype_name)
            mu_p, sig_p, b_p = self._padded_params(Kp, Np)
            seed_arr = jnp.asarray([seed], dtype=jnp.int32)
            return fwd(seed_arr, x, mu_p, sig_p, b_p)
        except Exception:
            # Fallback if the on-chip PRNG path cannot lower on this backend:
            # draw eps directly in (K, N) layout (no transpose relayout).
            if key is None:
                key = jax.random.PRNGKey(seed)
            eps_kn = jax.random.normal(key, (K, N), dtype=self.dtype)
            fwd, (Kp, Np) = _build_sample_forward(B, K, N, dtype_name)
            mu_p, sig_p, b_p = self._padded_params(Kp, Np)
            if (Kp, Np) != (K, N):
                eps_kn = jnp.pad(eps_kn, ((0, Kp - K), (0, Np - N)))
            return fwd(x, mu_p, eps_kn, sig_p, b_p)


# --------------------------------- main -------------------------------------

if __name__ == "__main__":
    key = jax.random.PRNGKey(0)
    k_param, k_x, k_eps = jax.random.split(key, 3)

    B, IN, OUT = 8, 32, 64
    layer = BayesianLinearPallas(IN, OUT, ratio=0.5, key=k_param)

    x = jax.random.normal(k_x, (B, IN), dtype=jnp.float32)

    # --- sample=False path (uses weight mean) ---
    y_mu = jax.block_until_ready(layer(x, sample=False))
    ref_mu = jnp.dot(x, layer.weight_mu.T,
                     precision=jax.lax.Precision.HIGHEST) + layer.bias
    assert y_mu.shape == (B, OUT)
    assert jnp.allclose(y_mu, ref_mu, atol=1e-4, rtol=1e-4), "mu path mismatch"

    # --- sample=True path with caller-provided epsilon (exact reference check) ---
    eps = jax.random.normal(k_eps, (OUT, IN), dtype=jnp.float32)
    y_s = jax.block_until_ready(layer(x, sample=True, eps=eps))
    sigma = jax.nn.softplus(layer.weight_rho)
    w_sampled = layer.weight_mu + sigma * eps
    ref_s = jnp.dot(x, w_sampled.T,
                    precision=jax.lax.Precision.HIGHEST) + layer.bias
    assert jnp.allclose(y_s, ref_s, atol=1e-4, rtol=1e-4), "sample path mismatch"

    # --- sample=True path with on-chip eps (default torch-like behaviour) ---
    y_r = jax.block_until_ready(layer(x, sample=True, seed=1234))
    assert y_r.shape == (B, OUT)
    assert bool(jnp.all(jnp.isfinite(y_r))), "on-chip sample produced non-finite values"
    # Injected noise should be non-degenerate but bounded (~unit std for this init).
    dstd = float(jnp.std(y_r - ref_mu))
    assert 0.01 < dstd < 50.0, f"on-chip sampled output looks degenerate: std={dstd}"

    print("KERNEL_OK")
</pallas_src>

<mosaic_0001>
module attributes {stable_mosaic.version = 11 : i64} {
  func.func @_mu_kernel(%arg0: i32, %arg1: i32, %arg2: i32, %arg3: memref<8x32xf32, #tpu.memory_space<vmem>>, %arg4: memref<32x128xf32, #tpu.memory_space<vmem>>, %arg5: memref<1x128xf32, #tpu.memory_space<vmem>>, %arg6: memref<8x128xf32, #tpu.memory_space<vmem>>, %arg7: memref<8x128xf32, #tpu.memory_space<vmem>>) attributes {dimension_semantics = [#tpu.dimension_semantics<parallel>, #tpu.dimension_semantics<parallel>, #tpu.dimension_semantics<arbitrary>], iteration_bounds = array<i64: 1, 1, 1>, scalar_prefetch = 0 : i64, scratch_operands = 1 : i64, tpu.core_type = #tpu.core_type<tc>, window_params = [{transform_indices = @transform_0, window_bounds = array<i64: 8, 32>}, {transform_indices = @transform_1, window_bounds = array<i64: 32, 128>}, {transform_indices = @transform_2, window_bounds = array<i64: 1, 128>}, {transform_indices = @transform_3, window_bounds = array<i64: 8, 128>}]} {
    %c0_i32 = arith.constant 0 : i32
    %0 = arith.cmpi eq, %arg2, %c0_i32 : i32
    %1 = arith.extui %0 : i1 to i32
    %c0_i32_0 = arith.constant 0 : i32
    %2 = arith.cmpi ne, %1, %c0_i32_0 : i32
    scf.if %2 {
      %cst_10 = arith.constant 0.000000e+00 : f32
      %12 = vector.broadcast %cst_10 : f32 to vector<8x128xf32>
      %c0_11 = arith.constant 0 : index
      %c0_12 = arith.constant 0 : index
      %13 = vector.load %arg7[%c0_11, %c0_12] : memref<8x128xf32, #tpu.memory_space<vmem>>, vector<8x128xf32>
      tpu.vector_store %arg7[%c0_11, %c0_12], %12 {strides = array<i32>} : memref<8x128xf32, #tpu.memory_space<vmem>>, vector<8x128xf32>,
    } else {
    }
    %c0 = arith.constant 0 : index
    %c0_1 = arith.constant 0 : index
    %3 = vector.load %arg7[%c0, %c0_1] : memref<8x128xf32, #tpu.memory_space<vmem>>, vector<8x128xf32>
    %c0_2 = arith.constant 0 : index
    %c0_3 = arith.constant 0 : index
    %4 = vector.load %arg3[%c0_2, %c0_3] : memref<8x32xf32, #tpu.memory_space<vmem>>, vector<8x32xf32>
    %c0_4 = arith.constant 0 : index
    %c0_5 = arith.constant 0 : index
    %5 = vector.load %arg4[%c0_4, %c0_5] : memref<32x128xf32, #tpu.memory_space<vmem>>, vector<32x128xf32>
    %cst = arith.constant dense<0.000000e+00> : vector<8x128xf32>
    %6 = tpu.matmul %4, %5, %cst {dimension_numbers = #tpu.dot_dimension_numbers<[1], [0], [0], [1], [0, 0, 1, 1], [], []>} : vector<8x32xf32>, vector<32x128xf32>, vector<8x128xf32> -> vector<8x128xf32>
    %7 = arith.addf %3, %6 : vector<8x128xf32>
    %c0_6 = arith.constant 0 : index
    %c0_7 = arith.constant 0 : index
    %8 = vector.load %arg7[%c0_6, %c0_7] : memref<8x128xf32, #tpu.memory_space<vmem>>, vector<8x128xf32>
    tpu.vector_store %arg7[%c0_6, %c0_7], %7 {strides = array<i32>} : memref<8x128xf32, #tpu.memory_space<vmem>>, vector<8x128xf32>,
    %c0_i32_8 = arith.constant 0 : i32
    %9 = arith.cmpi eq, %arg2, %c0_i32_8 : i32
    %10 = arith.extui %9 : i1 to i32
    %c0_i32_9 = arith.constant 0 : i32
    %11 = arith.cmpi ne, %10, %c0_i32_9 : i32
    scf.if %11 {
      %c0_10 = arith.constant 0 : index
      %c0_11 = arith.constant 0 : index
      %12 = vector.load %arg7[%c0_10, %c0_11] : memref<8x128xf32, #tpu.memory_space<vmem>>, vector<8x128xf32>
      %c0_12 = arith.constant 0 : index
      %c0_13 = arith.constant 0 : index
      %13 = vector.load %arg5[%c0_12, %c0_13] : memref<1x128xf32, #tpu.memory_space<vmem>>, vector<1x128xf32>
      %14 = vector.broadcast %13 : vector<1x128xf32> to vector<8x128xf32>
      %15 = arith.addf %12, %14 : vector<8x128xf32>
      %c0_14 = arith.constant 0 : index
      %c0_15 = arith.constant 0 : index
      %16 = vector.load %arg6[%c0_14, %c0_15] : memref<8x128xf32, #tpu.memory_space<vmem>>, vector<8x128xf32>
      tpu.vector_store %arg6[%c0_14, %c0_15], %15 {strides = array<i32>} : memref<8x128xf32, #tpu.memory_space<vmem>>, vector<8x128xf32>,
    } else {
    }
    return
  }
  func.func @transform_0(%arg0: i32, %arg1: i32, %arg2: i32) -> (i32, i32) {
    %c0_i32 = arith.constant 0 : i32
    return %arg0, %arg2 : i32, i32
  }
  func.func @transform_1(%arg0: i32, %arg1: i32, %arg2: i32) -> (i32, i32) {
    %c0_i32 = arith.constant 0 : i32
    return %arg2, %arg1 : i32, i32
  }
  func.func @transform_2(%arg0: i32, %arg1: i32, %arg2: i32) -> (i32, i32) {
    %c0_i32 = arith.constant 0 : i32
    %c0_i32_0 = arith.constant 0 : i32
    return %c0_i32, %arg1 : i32, i32
  }
  func.func @transform_3(%arg0: i32, %arg1: i32, %arg2: i32) -> (i32, i32) {
    %c0_i32 = arith.constant 0 : i32
    return %arg0, %arg1 : i32, i32
  }
}

</mosaic_0001>

<bundles_post_ra>
// kernel: fwd.1
= control target key start
LH: loop header
LB: loop body
LE: loop exit
PB: predicated region body
PF: predicated region fallthrough
CT: control target
= control target key end

     0   :  { %8 = vsyncpa [#allocation4], 0  ;;  %s287_s0 = inlined_call_operand.hbm [shape: f32[8,32], index: 0, kind: input, shape index: {}]   ;;  %s288_s1 = inlined_call_operand.hbm [shape: f32[32,128], index: 1, kind: input, shape index: {}]   ;;  %s289_s2 = inlined_call_operand.vmem [shape: f32[1,128], index: 2, kind: input, shape index: {}]   ;;  %s290_s3 = inlined_call_operand.hbm [shape: f32[8,128], index: 3, kind: output, shape index: {}]  }
   0x1   :  { %9 = vsyncpa [#allocation7], 0 }
   0x2   :  { %10 = vsyncpa [#allocation5], 0  ;;  %s248_s12 = smov [#allocation3]   ;;  %s249_s14 = smov [#allocation6]  }
   0x3   :  { %s17_s13 = sshll.u32 %s248_s12, 4  ;;  %s26_s15 = sshll.u32 %s249_s14, 4  ;;  %s18_s13 = int_to_ptr.vmem [resolvable:$true] %s17_s13  ;;  %s27_s15 = int_to_ptr.vmem [resolvable:$true] %s26_s15 }
   0x4   :  { %s190_s16 = scalar_lea.vmem %s18_s13, 128  ;;  %p195_p1 = scmp.lt.s32.totalorder %s18_s13, %s18_s13 }
   0x5   :  { %p191_p0 = scmp.ne.s32.totalorder %s18_s13, %s190_s16  ;;  %p196_p2 = scmp.lt.s32.totalorder %s190_s16, %s190_s16 }
   0x7   :  { %p197_p3 = por %p196_p2, %p195_p1 }
   0x9   :  { %p198_p4 = pnand %p197_p3, %p191_p0 }
   0xb   :  { %201 = shalt.err (!%p198_p4)
}
   0xc   :  { %20 = dma.hbm_to_vmem [thread:$0]  %s287_s0, 128, %s18_s13, [#allocation4]  }
   0xd   :  { %s210_s19 = scalar_lea.vmem %s27_s15, 512  ;;  %p215_p6 = scmp.lt.s32.totalorder %s27_s15, %s27_s15 }
   0xe   :  { %p211_p5 = scmp.ne.s32.totalorder %s27_s15, %s210_s19  ;;  %p216_p7 = scmp.lt.s32.totalorder %s210_s19, %s210_s19 }
  0x10   :  { %p217_p8 = por %p216_p7, %p215_p6 }
  0x12   :  { %p218_p9 = pnand %p217_p8, %p211_p5 }
  0x14   :  { %221 = shalt.err (!%p218_p9)
}
  0x15   :  { %s250_s20 = smov 128   ;;  %s251_s21 = smov 8  }
  0x16   :  { %32 = dma.hbm_to_vmem [thread:$0]  %s288_s1, 512, %s27_s15, [#allocation7], %s250_s20, %s250_s20, %s251_s21  }
  0x17   :  { %242 = dma.done.wait [#allocation4], 128  }
  0x18   :  { %243 = vsyncadd [#allocation4], 4294967168 }
  0x19   :  { %244 = dma.done.wait [#allocation7], 512  }
  0x1a   :  { %245 = vsyncadd [#allocation7], 4294966784  ;;  %v252_v0 = vmov 0.0   ;;  %vm253_vm0 = vmmov 0   ;;  %v51_v1 = vld [vmem:[#allocation6 + $0x18] sm:$0xff]  ;;  %v50_v2 = vld [vmem:[#allocation6 + $0x10] sm:$0xff] }
  0x1b   :  { %164 = vmatprep.subr.mxu0 %v252_v0  ;;  %172 = vmatprep.mubr.msk.f32.mxu0 %vm253_vm0, %v252_v0  ;;  %v49_v3 = vld [vmem:[#allocation6 + $0x8] sm:$0xff]  ;;  %v48_v4 = vld [vmem:[#allocation6] sm:$0xff]  ;;  %v47_v5 = vld [vmem:[#allocation3] sm:$0xff]  ;;  %vm52_vm1 = vcmask 261120   ;;  %s254_s24 = smov [#allocation8]  }
  0x1c   :  { %165 = vmatpush3.msra.mxu0 %v51_v1  ;;  %v158_v6 = vld [vmem:[%s289_s2] ss:$0 sm:$0xff]  ;;  %s147_s25 = sshll.u32 %s254_s24, 4  ;;  %s148_s25 = int_to_ptr.vmem [resolvable:$true] %s147_s25 }
  0x1d   :  { %166 = vmatprep.subr.mxu0 %v252_v0  ;;  %s222_s26 = scalar_lea.vmem %s148_s25, 128  ;;  %p227_p11 = scmp.lt.s32.totalorder %s148_s25, %s148_s25 }
  0x1e   :  { %167 = vmatpush3.msra.mxu0 %v50_v2  ;;  %p223_p10 = scmp.ne.s32.totalorder %s148_s25, %s222_s26  ;;  %p228_p12 = scmp.lt.s32.totalorder %s222_s26, %s222_s26 }
  0x1f   :  { %168 = vmatprep.subr.mxu0 %v252_v0 }
  0x20   :  { %169 = vmatpush3.msra.mxu0 %v49_v3  ;;  %p229_p13 = por %p228_p12, %p227_p11 }
  0x21   :  { %170 = vmatprep.subr.mxu0 %v252_v0 }
  0x22   :  { %171 = vmatpush3.msra.mxu0 %v48_v4  ;;  %p230_p0 = pnand %p229_p13, %p223_p10 }
  0x23   :  { %173 = vmatmul.mubr.msk.f32.vlgmr.msra.gmra.mxu0 %vm52_vm1, %v47_v5 }
  0xe3   :  { %v122_v7 = vpop.f32.mrf.mxu0 }
  0xe4   :  { %v139_v8 = vadd.f32 %v158_v6, %v122_v7 }
  0xe5   :  { %v174_v9 = vpop.f32.mrf.mxu0 }
  0xe6   :  { %140 = vst [vmem:[#allocation8] sm:$0xff] %v139_v8 }
  0xe7   :  { %233 = shalt.err (!%p230_p0)
}
  0xe8   :  { %150 = dma.vmem_to_hbm [thread:$0]  %s148_s25, 128, %s290_s3, [#allocation5]  }
  0xe9   :  { %246 = dma.done.wait [#allocation5], 128  }
  0xea   :  { %247 = vsyncadd [#allocation5], 4294967168 }
  0xeb   :  { %154 = vsyncpa [#allocation4], 1 }
  0xec   :  { %155 = vsyncpa [#allocation7], 1 }
  0xed   :  { %156 = vsyncpa [#allocation5], 1 }

</bundles_post_ra>
